<compile_context>
chip_gen: v7x
topology: tpu7x:2x2x1
jax: 0.10.0
libtpu: 0.0.40
codegen_flags: <defaults>
</compile_context>

<pallas_src>
import math
import functools

import jax
import jax.numpy as jnp
from jax.experimental import pallas as pl
from jax.experimental.pallas import tpu as pltpu


# ----------------------------------------------------------------------------
# Kernel
# ----------------------------------------------------------------------------
def gru_cell_kernel(xk_ref, hxk_ref, hx_ref, whr_ref, wxzh_ref, whz_ref,
                    whh_ref, br_ref, bzh_ref, out_ref, accz_ref, accc_ref):
    """Grid = (batch_tiles, K_tiles); K tiles the contraction (= hidden) dim.

    Per (b, k) step:
      xk_ref   (bm, tk)  f32   x[:, kblk]
      hxk_ref  (bm, tk)  f32   hx[:, kblk]
      hx_ref   (bm, H)   f32   full-width hx (resident per batch tile)
      whr_ref  (H, tk)   bf16  column block of whr.T
      wxzh_ref (tk, 2H)  bf16  row block of [wxz.T | wxh.T]  (fused x-side)
      whz_ref  (tk, H)   bf16  row block of whz.T
      whh_ref  (tk, H)   bf16  row block of whh.T
      br_ref   (bm, tk)  f32   br[:, kblk]
      bzh_ref  (bm, 2H)  f32   [bz | bh] (resident per batch tile)
      out_ref  (bm, H)         written at the last K step
      accz/accc (bm, H)  f32   VMEM accumulators (z / candidate pre-activation)
    """
    k = pl.program_id(1)
    nk = pl.num_programs(1)
    H = out_ref.shape[1]
    bf16 = jnp.bfloat16
    f32 = jnp.float32

    @pl.when(k == 0)
    def _init():
        accz_ref[...] = jnp.zeros_like(accz_ref)
        accc_ref[...] = jnp.zeros_like(accc_ref)

    x_blk = xk_ref[...]          # (bm, tk) f32
    hx_blk = hxk_ref[...]        # (bm, tk) f32
    hx_full = hx_ref[...]        # (bm, H)  f32

    # Reset gate, column slice for this K block:
    #   qr[:, kblk] = sigmoid(x + hx @ whr.T + br)[:, kblk]
    hr = jnp.dot(hx_full.astype(bf16), whr_ref[...],
                 preferred_element_type=f32)                       # (bm, tk)
    qr = jax.nn.sigmoid(x_blk + hr + br_ref[...])
    r_blk = (qr * hx_blk).astype(bf16)                             # (bm, tk)

    # Fused x-side matmul: x[:, kblk] @ [wxz.T | wxh.T][kblk, :] -> (bm, 2H)
    xw = jnp.dot(x_blk.astype(bf16), wxzh_ref[...],
                 preferred_element_type=f32)

    # Accumulate z and candidate pre-activations (f32).
    accz_ref[...] += xw[:, :H] + jnp.dot(hx_blk.astype(bf16), whz_ref[...],
                                         preferred_element_type=f32)
    accc_ref[...] += xw[:, H:] + jnp.dot(r_blk, whh_ref[...],
                                         preferred_element_type=f32)

    @pl.when(k == nk - 1)
    def _finalize():
        bzh = bzh_ref[...]
        qz = jax.nn.sigmoid(accz_ref[...] + bzh[:, :H])
        ht = jnp.tanh(accc_ref[...] + bzh[:, H:]) * qz + hx_full * (1.0 - qz)
        out_ref[...] = ht.astype(out_ref.dtype)


# ----------------------------------------------------------------------------
# One-time parameter packing (kept OUT of the per-step hot path)
# ----------------------------------------------------------------------------
def pack_params(weight_ih, weight_hh, bias, *, weight_dtype=jnp.bfloat16):
    """Transpose/split/cast weights once.

    * drops the dead wxr block (weight_ih[:H]) entirely
    * fuses x-side z/h weights into one (I, 2H) matrix
    * stores all weights in bf16 (MXU-native, halves HBM/VMEM traffic)
    """
    H = weight_hh.shape[1]
    wxz = weight_ih[H:2 * H]            # (H, I)
    wxh = weight_ih[2 * H:]             # (H, I)
    wxzh_t = jnp.concatenate([wxz.T, wxh.T], axis=1).astype(weight_dtype)  # (I, 2H)
    whr_t = weight_hh[:H].T.astype(weight_dtype)                           # (H, H)
    whz_t = weight_hh[H:2 * H].T.astype(weight_dtype)                      # (H, H)
    whh_t = weight_hh[2 * H:].T.astype(weight_dtype)                       # (H, H)
    br = bias[:, :H].astype(jnp.float32)                                   # (B, H)
    bzh = bias[:, H:].astype(jnp.float32)                                  # (B, 2H)
    return wxzh_t, whr_t, whz_t, whh_t, br, bzh


# ----------------------------------------------------------------------------
# Wrapper
# ----------------------------------------------------------------------------
@functools.partial(jax.jit, static_argnames=("bm", "tk", "vmem_limit_bytes"))
def gru_cell_m2(x, hx, params, *, bm=None, tk=None, vmem_limit_bytes=None):
    wxzh_t, whr_t, whz_t, whh_t, br, bzh = params
    B, I = x.shape
    H = hx.shape[1]
    if I != H:
        raise ValueError("GRUCellM2 forward requires input_size == hidden_size")

    # Tile sizes. tk must be a multiple of 128 (lane-aligned weight blocks)
    # unless it covers the full dim. Sized so double-buffered weight blocks fit
    # comfortably in scoped VMEM (re-derive for v7x's 64 MiB if raising tk).
    if bm is None:
        bm = B if B <= 128 else 128
    if tk is None:
        tk = H if H <= 512 else 512
    assert B % bm == 0 and (bm == B or bm % 8 == 0)
    assert H % tk == 0 and (tk == H or tk % 128 == 0)
    nb, nk = B // bm, H // tk
    H2 = 2 * H

    grid_spec = pltpu.PrefetchScalarGridSpec(
        num_scalar_prefetch=0,
        grid=(nb, nk),
        in_specs=[
            pl.BlockSpec((bm, tk), lambda b, k: (b, k)),   # x[:, kblk]
            pl.BlockSpec((bm, tk), lambda b, k: (b, k)),   # hx[:, kblk]
            pl.BlockSpec((bm, H),  lambda b, k: (b, 0)),   # hx full (resident)
            pl.BlockSpec((H, tk),  lambda b, k: (0, k)),   # whr.T col block
            pl.BlockSpec((tk, H2), lambda b, k: (k, 0)),   # [wxz.T|wxh.T] row blk
            pl.BlockSpec((tk, H),  lambda b, k: (k, 0)),   # whz.T row block
            pl.BlockSpec((tk, H),  lambda b, k: (k, 0)),   # whh.T row block
            pl.BlockSpec((bm, tk), lambda b, k: (b, k)),   # br[:, kblk]
            pl.BlockSpec((bm, H2), lambda b, k: (b, 0)),   # [bz|bh] (resident)
        ],
        out_specs=pl.BlockSpec((bm, H), lambda b, k: (b, 0)),
        scratch_shapes=[pltpu.VMEM((bm, H), jnp.float32),   # acc_z
                        pltpu.VMEM((bm, H), jnp.float32)],  # acc_c
    )
    # NOTE: for a recurrent timestep loop, hx could additionally be aliased to
    # the output via input_output_aliases to avoid an extra HBM buffer per step.
    return pl.pallas_call(
        gru_cell_kernel,
        out_shape=jax.ShapeDtypeStruct((B, H), x.dtype),
        grid_spec=grid_spec,
        compiler_params=pltpu.CompilerParams(
            dimension_semantics=("parallel", "arbitrary"),
            vmem_limit_bytes=vmem_limit_bytes),
    )(x, hx, hx, whr_t, wxzh_t, whz_t, whh_t, br, bzh)


# ----------------------------------------------------------------------------
# References
# ----------------------------------------------------------------------------
def reference_f32(x, hx, weight_ih, weight_hh, bias):
    """Pure-JAX f32 reference mirroring the PyTorch forward exactly."""
    H = hx.shape[1]
    wxz = weight_ih[H:2 * H]
    wxh = weight_ih[2 * H:]
    whr = weight_hh[:H]
    whz = weight_hh[H:2 * H]
    whh = weight_hh[2 * H:]
    br, bz, bh = bias[:, :H], bias[:, H:2 * H], bias[:, 2 * H:]
    qz = jax.nn.sigmoid(x @ wxz.T + hx @ whz.T + bz)
    qr = jax.nn.sigmoid(x + hx @ whr.T + br)
    return jnp.tanh((qr * hx) @ whh.T + x @ wxh.T + bh) * qz + hx * (1 - qz)


def reference_bf16(x, hx, weight_ih, weight_hh, bias):
    """Reference mirroring the kernel's numerics (bf16 matmul inputs, f32 acc)."""
    H = hx.shape[1]
    q = lambda a: a.astype(jnp.bfloat16).astype(jnp.float32)
    wxz = q(weight_ih[H:2 * H].T)
    wxh = q(weight_ih[2 * H:].T)
    whr = q(weight_hh[:H].T)
    whz = q(weight_hh[H:2 * H].T)
    whh = q(weight_hh[2 * H:].T)
    br, bz, bh = bias[:, :H], bias[:, H:2 * H], bias[:, 2 * H:]
    qz = jax.nn.sigmoid(q(x) @ wxz + q(hx) @ whz + bz)
    qr = jax.nn.sigmoid(x + q(hx) @ whr + br)
    return jnp.tanh(q(qr * hx) @ whh + q(x) @ wxh + bh) * qz + hx * (1 - qz)


# ----------------------------------------------------------------------------
# Demo / self-test
# ----------------------------------------------------------------------------
if __name__ == "__main__":
    # input_size must equal hidden_size (the module adds x directly in qr).
    B, I, H = 8, 256, 256

    key = jax.random.PRNGKey(0)
    kw1, kw2, kb, kx, kh = jax.random.split(key, 5)
    bound_ih = 1.0 / math.sqrt(I)   # kaiming_uniform_(a=sqrt(5)) bound, fan_in=I
    bound_hh = 1.0 / math.sqrt(H)
    weight_ih = jax.random.uniform(kw1, (3 * H, I), jnp.float32, -bound_ih, bound_ih)
    weight_hh = jax.random.uniform(kw2, (3 * H, H), jnp.float32, -bound_hh, bound_hh)
    bias = jax.random.uniform(kb, (B, 3 * H), jnp.float32, -bound_ih, bound_ih)
    x = jax.random.normal(kx, (B, I), jnp.float32)
    hx = jax.random.normal(kh, (B, H), jnp.float32)

    # One-time packing (dead wxr dropped, bf16 weights, fused x-side weights).
    params = pack_params(weight_ih, weight_hh, bias)

    # tk=128 -> grid (1, 2): exercises streamed weight blocks + accumulators.
    out = gru_cell_m2(x, hx, params, tk=128)
    out = jax.block_until_ready(out)

    ref_b = reference_bf16(x, hx, weight_ih, weight_hh, bias)
    ref_f = reference_f32(x, hx, weight_ih, weight_hh, bias)

    assert out.shape == (B, H)
    assert jnp.allclose(out, ref_b, atol=1e-3, rtol=1e-3), "mismatch vs bf16 reference"
    assert jnp.allclose(out, ref_f, atol=1e-2, rtol=1e-2), "mismatch vs f32 reference"

    print("KERNEL_OK")
</pallas_src>

<mosaic_0001>
module attributes {stable_mosaic.version = 11 : i64} {
  func.func @gru_cell_kernel(%arg0: i32, %arg1: i32, %arg2: memref<8x128xf32, #tpu.memory_space<vmem>>, %arg3: memref<8x128xf32, #tpu.memory_space<vmem>>, %arg4: memref<8x256xf32, #tpu.memory_space<vmem>>, %arg5: memref<256x128xbf16, #tpu.memory_space<vmem>>, %arg6: memref<128x512xbf16, #tpu.memory_space<vmem>>, %arg7: memref<128x256xbf16, #tpu.memory_space<vmem>>, %arg8: memref<128x256xbf16, #tpu.memory_space<vmem>>, %arg9: memref<8x128xf32, #tpu.memory_space<vmem>>, %arg10: memref<8x512xf32, #tpu.memory_space<vmem>>, %arg11: memref<8x256xf32, #tpu.memory_space<vmem>>, %arg12: memref<8x256xf32, #tpu.memory_space<vmem>>, %arg13: memref<8x256xf32, #tpu.memory_space<vmem>>) attributes {dimension_semantics = [#tpu.dimension_semantics<parallel>, #tpu.dimension_semantics<arbitrary>], iteration_bounds = array<i64: 1, 2>, scalar_prefetch = 0 : i64, scratch_operands = 2 : i64, tpu.core_type = #tpu.core_type<tc>, window_params = [{transform_indices = @transform_0, window_bounds = array<i64: 8, 128>}, {transform_indices = @transform_1, window_bounds = array<i64: 8, 128>}, {transform_indices = @transform_2, window_bounds = array<i64: 8, 256>}, {transform_indices = @transform_3, window_bounds = array<i64: 256, 128>}, {transform_indices = @transform_4, window_bounds = array<i64: 128, 512>}, {transform_indices = @transform_5, window_bounds = array<i64: 128, 256>}, {transform_indices = @transform_6, window_bounds = array<i64: 128, 256>}, {transform_indices = @transform_7, window_bounds = array<i64: 8, 128>}, {transform_indices = @transform_8, window_bounds = array<i64: 8, 512>}, {transform_indices = @transform_9, window_bounds = array<i64: 8, 256>}]} {
    %c0_i32 = arith.constant 0 : i32
    %0 = arith.cmpi eq, %arg1, %c0_i32 : i32
    %1 = arith.extui %0 : i1 to i32
    %c0_i32_0 = arith.constant 0 : i32
    %2 = arith.cmpi ne, %1, %c0_i32_0 : i32
    scf.if %2 {
      %cst_29 = arith.constant 0.000000e+00 : f32
      %40 = vector.broadcast %cst_29 : f32 to vector<8x256xf32>
      %c0_30 = arith.constant 0 : index
      %c0_31 = arith.constant 0 : index
      %41 = vector.load %arg12[%c0_30, %c0_31] : memref<8x256xf32, #tpu.memory_space<vmem>>, vector<8x256xf32>
      tpu.vector_store %arg12[%c0_30, %c0_31], %40 {strides = array<i32>} : memref<8x256xf32, #tpu.memory_space<vmem>>, vector<8x256xf32>,
      %cst_32 = arith.constant 0.000000e+00 : f32
      %42 = vector.broadcast %cst_32 : f32 to vector<8x256xf32>
      %c0_33 = arith.constant 0 : index
      %c0_34 = arith.constant 0 : index
      %43 = vector.load %arg13[%c0_33, %c0_34] : memref<8x256xf32, #tpu.memory_space<vmem>>, vector<8x256xf32>
      tpu.vector_store %arg13[%c0_33, %c0_34], %42 {strides = array<i32>} : memref<8x256xf32, #tpu.memory_space<vmem>>, vector<8x256xf32>,
    } else {
    }
    %c0 = arith.constant 0 : index
    %c0_1 = arith.constant 0 : index
    %3 = vector.load %arg2[%c0, %c0_1] : memref<8x128xf32, #tpu.memory_space<vmem>>, vector<8x128xf32>
    %c0_2 = arith.constant 0 : index
    %c0_3 = arith.constant 0 : index
    %4 = vector.load %arg3[%c0_2, %c0_3] : memref<8x128xf32, #tpu.memory_space<vmem>>, vector<8x128xf32>
    %c0_4 = arith.constant 0 : index
    %c0_5 = arith.constant 0 : index
    %5 = vector.load %arg4[%c0_4, %c0_5] : memref<8x256xf32, #tpu.memory_space<vmem>>, vector<8x256xf32>
    %6 = arith.truncf %5 : vector<8x256xf32> to vector<8x256xbf16>
    %c0_6 = arith.constant 0 : index
    %c0_7 = arith.constant 0 : index
    %7 = vector.load %arg5[%c0_6, %c0_7] : memref<256x128xbf16, #tpu.memory_space<vmem>>, vector<256x128xbf16>
    %cst = arith.constant dense<0.000000e+00> : vector<8x128xf32>
    %8 = tpu.matmul %6, %7, %cst {dimension_numbers = #tpu.dot_dimension_numbers<[1], [0], [0], [1], [0, 0, 1, 1], [], []>} : vector<8x256xbf16>, vector<256x128xbf16>, vector<8x128xf32> -> vector<8x128xf32>
    %9 = arith.addf %3, %8 : vector<8x128xf32>
    %c0_8 = arith.constant 0 : index
    %c0_9 = arith.constant 0 : index
    %10 = vector.load %arg9[%c0_8, %c0_9] : memref<8x128xf32, #tpu.memory_space<vmem>>, vector<8x128xf32>
    %11 = arith.addf %9, %10 : vector<8x128xf32>
    %12 = arith.negf %11 : vector<8x128xf32>
    %13 = math.exp %12 : vector<8x128xf32>
    %cst_10 = arith.constant 1.000000e+00 : f32
    %14 = vector.broadcast %cst_10 : f32 to vector<8x128xf32>
    %15 = arith.addf %14, %13 : vector<8x128xf32>
    %16 = arith.divf %14, %15 : vector<8x128xf32>
    %17 = arith.mulf %16, %4 : vector<8x128xf32>
    %18 = arith.truncf %17 : vector<8x128xf32> to vector<8x128xbf16>
    %19 = arith.truncf %3 : vector<8x128xf32> to vector<8x128xbf16>
    %c0_11 = arith.constant 0 : index
    %c0_12 = arith.constant 0 : index
    %20 = vector.load %arg6[%c0_11, %c0_12] : memref<128x512xbf16, #tpu.memory_space<vmem>>, vector<128x512xbf16>
    %cst_13 = arith.constant dense<0.000000e+00> : vector<8x512xf32>
    %21 = tpu.matmul %19, %20, %cst_13 {dimension_numbers = #tpu.dot_dimension_numbers<[1], [0], [0], [1], [0, 0, 1, 1], [], []>} : vector<8x128xbf16>, vector<128x512xbf16>, vector<8x512xf32> -> vector<8x512xf32>
    %c0_14 = arith.constant 0 : index
    %c0_15 = arith.constant 0 : index
    %22 = vector.load %arg12[%c0_14, %c0_15] : memref<8x256xf32, #tpu.memory_space<vmem>>, vector<8x256xf32>
    %23 = vector.extract_strided_slice %21 {offsets = [0, 0], sizes = [8, 256], strides = [1, 1]} : vector<8x512xf32> to vector<8x256xf32>
    %24 = arith.truncf %4 : vector<8x128xf32> to vector<8x128xbf16>
    %c0_16 = arith.constant 0 : index
    %c0_17 = arith.constant 0 : index
    %25 = vector.load %arg7[%c0_16, %c0_17] : memref<128x256xbf16, #tpu.memory_space<vmem>>, vector<128x256xbf16>
    %cst_18 = arith.constant dense<0.000000e+00> : vector<8x256xf32>
    %26 = tpu.matmul %24, %25, %cst_18 {dimension_numbers = #tpu.dot_dimension_numbers<[1], [0], [0], [1], [0, 0, 1, 1], [], []>} : vector<8x128xbf16>, vector<128x256xbf16>, vector<8x256xf32> -> vector<8x256xf32>
    %27 = arith.addf %23, %26 : vector<8x256xf32>
    %28 = arith.addf %22, %27 : vector<8x256xf32>
    %c0_19 = arith.constant 0 : index
    %c0_20 = arith.constant 0 : index
    %29 = vector.load %arg12[%c0_19, %c0_20] : memref<8x256xf32, #tpu.memory_space<vmem>>, vector<8x256xf32>
    tpu.vector_store %arg12[%c0_19, %c0_20], %28 {strides = array<i32>} : memref<8x256xf32, #tpu.memory_space<vmem>>, vector<8x256xf32>,
    %c0_21 = arith.constant 0 : index
    %c0_22 = arith.constant 0 : index
    %30 = vector.load %arg13[%c0_21, %c0_22] : memref<8x256xf32, #tpu.memory_space<vmem>>, vector<8x256xf32>
    %31 = vector.extract_strided_slice %21 {offsets = [0, 256], sizes = [8, 256], strides = [1, 1]} : vector<8x512xf32> to vector<8x256xf32>
    %c0_23 = arith.constant 0 : index
    %c0_24 = arith.constant 0 : index
    %32 = vector.load %arg8[%c0_23, %c0_24] : memref<128x256xbf16, #tpu.memory_space<vmem>>, vector<128x256xbf16>
    %cst_25 = arith.constant dense<0.000000e+00> : vector<8x256xf32>
    %33 = tpu.matmul %18, %32, %cst_25 {dimension_numbers = #tpu.dot_dimension_numbers<[1], [0], [0], [1], [0, 0, 1, 1], [], []>} : vector<8x128xbf16>, vector<128x256xbf16>, vector<8x256xf32> -> vector<8x256xf32>
    %34 = arith.addf %31, %33 : vector<8x256xf32>
    %35 = arith.addf %30, %34 : vector<8x256xf32>
    %c0_26 = arith.constant 0 : index
    %c0_27 = arith.constant 0 : index
    %36 = vector.load %arg13[%c0_26, %c0_27] : memref<8x256xf32, #tpu.memory_space<vmem>>, vector<8x256xf32>
    tpu.vector_store %arg13[%c0_26, %c0_27], %35 {strides = array<i32>} : memref<8x256xf32, #tpu.memory_space<vmem>>, vector<8x256xf32>,
    %c1_i32 = arith.constant 1 : i32
    %37 = arith.cmpi eq, %arg1, %c1_i32 : i32
    %38 = arith.extui %37 : i1 to i32
    %c0_i32_28 = arith.constant 0 : i32
    %39 = arith.cmpi ne, %38, %c0_i32_28 : i32
    scf.if %39 {
      %c0_29 = arith.constant 0 : index
      %c0_30 = arith.constant 0 : index
      %40 = vector.load %arg10[%c0_29, %c0_30] : memref<8x512xf32, #tpu.memory_space<vmem>>, vector<8x512xf32>
      %c0_31 = arith.constant 0 : index
      %c0_32 = arith.constant 0 : index
      %41 = vector.load %arg12[%c0_31, %c0_32] : memref<8x256xf32, #tpu.memory_space<vmem>>, vector<8x256xf32>
      %42 = vector.extract_strided_slice %40 {offsets = [0, 0], sizes = [8, 256], strides = [1, 1]} : vector<8x512xf32> to vector<8x256xf32>
      %43 = arith.addf %41, %42 : vector<8x256xf32>
      %44 = arith.negf %43 : vector<8x256xf32>
      %45 = math.exp %44 : vector<8x256xf32>
      %cst_33 = arith.constant 1.000000e+00 : f32
      %46 = vector.broadcast %cst_33 : f32 to vector<8x256xf32>
      %47 = arith.addf %46, %45 : vector<8x256xf32>
      %48 = arith.divf %46, %47 : vector<8x256xf32>
      %c0_34 = arith.constant 0 : index
      %c0_35 = arith.constant 0 : index
      %49 = vector.load %arg13[%c0_34, %c0_35] : memref<8x256xf32, #tpu.memory_space<vmem>>, vector<8x256xf32>
      %50 = vector.extract_strided_slice %40 {offsets = [0, 256], sizes = [8, 256], strides = [1, 1]} : vector<8x512xf32> to vector<8x256xf32>
      %51 = arith.addf %49, %50 : vector<8x256xf32>
      %52 = math.tanh %51 : vector<8x256xf32>
      %53 = arith.mulf %52, %48 : vector<8x256xf32>
      %cst_36 = arith.constant 1.000000e+00 : f32
      %54 = vector.broadcast %cst_36 : f32 to vector<8x256xf32>
      %55 = arith.subf %54, %48 : vector<8x256xf32>
      %56 = arith.mulf %5, %55 : vector<8x256xf32>
      %57 = arith.addf %53, %56 : vector<8x256xf32>
      %c0_37 = arith.constant 0 : index
      %c0_38 = arith.constant 0 : index
      %58 = vector.load %arg11[%c0_37, %c0_38] : memref<8x256xf32, #tpu.memory_space<vmem>>, vector<8x256xf32>
      tpu.vector_store %arg11[%c0_37, %c0_38], %57 {strides = array<i32>} : memref<8x256xf32, #tpu.memory_space<vmem>>, vector<8x256xf32>,
    } else {
    }
    return
  }
  func.func @transform_0(%arg0: i32, %arg1: i32) -> (i32, i32) {
    %c0_i32 = arith.constant 0 : i32
    return %arg0, %arg1 : i32, i32
  }
  func.func @transform_1(%arg0: i32, %arg1: i32) -> (i32, i32) {
    %c0_i32 = arith.constant 0 : i32
    return %arg0, %arg1 : i32, i32
  }
  func.func @transform_2(%arg0: i32, %arg1: i32) -> (i32, i32) {
    %c0_i32 = arith.constant 0 : i32
    %c0_i32_0 = arith.constant 0 : i32
    return %arg0, %c0_i32 : i32, i32
  }
  func.func @transform_3(%arg0: i32, %arg1: i32) -> (i32, i32) {
    %c0_i32 = arith.constant 0 : i32
    %c0_i32_0 = arith.constant 0 : i32
    return %c0_i32, %arg1 : i32, i32
  }
  func.func @transform_4(%arg0: i32, %arg1: i32) -> (i32, i32) {
    %c0_i32 = arith.constant 0 : i32
    %c0_i32_0 = arith.constant 0 : i32
    return %arg1, %c0_i32 : i32, i32
  }
  func.func @transform_5(%arg0: i32, %arg1: i32) -> (i32, i32) {
    %c0_i32 = arith.constant 0 : i32
    %c0_i32_0 = arith.constant 0 : i32
    return %arg1, %c0_i32 : i32, i32
  }
  func.func @transform_6(%arg0: i32, %arg1: i32) -> (i32, i32) {
    %c0_i32 = arith.constant 0 : i32
    %c0_i32_0 = arith.constant 0 : i32
    return %arg1, %c0_i32 : i32, i32
  }
  func.func @transform_7(%arg0: i32, %arg1: i32) -> (i32, i32) {
    %c0_i32 = arith.constant 0 : i32
    return %arg0, %arg1 : i32, i32
  }
  func.func @transform_8(%arg0: i32, %arg1: i32) -> (i32, i32) {
    %c0_i32 = arith.constant 0 : i32
    %c0_i32_0 = arith.constant 0 : i32
    return %arg0, %c0_i32 : i32, i32
  }
  func.func @transform_9(%arg0: i32, %arg1: i32) -> (i32, i32) {
    %c0_i32 = arith.constant 0 : i32
    %c0_i32_0 = arith.constant 0 : i32
    return %arg0, %c0_i32 : i32, i32
  }
}

</mosaic_0001>

<bundles_post_ra>
// kernel: gru_cell_m2.1
= control target key start
LH: loop header
LB: loop body
LE: loop exit
PB: predicated region body
PF: predicated region fallthrough
CT: control target
= control target key end

     0   :  { %s2978_s0 = inlined_call_operand.hbm [shape: f32[8,256], index: 0, kind: input, shape index: {}]   ;;  %s2979_s1 = inlined_call_operand.hbm [shape: f32[8,256], index: 1, kind: input, shape index: {}, may-alias: {1,2}]   ;;  %s2980_s2 = inlined_call_operand.hbm [shape: f32[8,256], index: 2, kind: input, shape index: {}, may-alias: {1,2}]   ;;  %s2981_s3 = inlined_call_operand.hbm [shape: bf16[256,256], index: 3, kind: input, shape index: {}]   ;;  %s2982_s4 = inlined_call_operand.hbm [shape: bf16[256,512], index: 4, kind: input, shape index: {}]   ;;  %s2983_s5 = inlined_call_operand.hbm [shape: bf16[256,256], index: 5, kind: input, shape index: {}]   ;;  %s2984_s6 = inlined_call_operand.hbm [shape: bf16[256,256], index: 6, kind: input, shape index: {}]   ;;  %s2985_s7 = inlined_call_operand.vmem [shape: f32[8,256], index: 7, kind: input, shape index: {}]   ;;  %s2986_s8 = inlined_call_operand.hbm [shape: f32[8,512], index: 8, kind: input, shape index: {}]   ;;  %s2987_s9 = inlined_call_operand.hbm [shape: f32[8,256], index: 9, kind: output, shape index: {}]  }
   0x1   :  { %3007 = sst [smem:[#allocation32_spill]] %s2980_s2 }
   0x2   :  { %3008 = sst [smem:[#allocation33_spill]] %s2981_s3 }
   0x3   :  { %3009 = sst [smem:[#allocation34_spill]] %s2983_s5 }
   0x4   :  { %3010 = sst [smem:[#allocation35_spill]] %s2985_s7 }
   0x5   :  { %3011 = sst [smem:[#allocation36_spill]] %s2987_s9 }
   0x6   :  { %14 = vsyncpa [#allocation5], 0 }
   0x7   :  { %16 = vsyncpa [#allocation5 + $0x1], 0 }
   0x8   :  { %17 = vsyncpa [#allocation8], 0 }
   0x9   :  { %19 = vsyncpa [#allocation8 + $0x1], 0 }
   0xa   :  { %20 = vsyncpa [#allocation11], 0 }
   0xb   :  { %22 = vsyncpa [#allocation11 + $0x1], 0 }
   0xc   :  { %23 = vsyncpa [#allocation14], 0 }
   0xd   :  { %25 = vsyncpa [#allocation14 + $0x1], 0 }
   0xe   :  { %26 = vsyncpa [#allocation17], 0 }
   0xf   :  { %27 = vsyncpa [#allocation6], 0  ;;  %s2453_s30 = smov 0   ;;  %s2455_s10 = smov 0  }
  0x10   :  { %s2457_s11 = smov 0   ;;  %s2459_s12 = smov 0  }
  0x11   :  { %s2461_s13 = smov 0   ;;  %s2463_s14 = smov 0  }
  0x12 LB: > { %3012 = sst [smem:[#allocation26_spill]] %s2372_s11  ;;  %s2482_s15 = sadd.s32 4294967295, %s2384_s14   ;;  %s2384_s14 = sphi %s2463_s14, %s33_s14   ;;  %s2380_s13 = sphi %s2461_s13, %s3055_s13   ;;  %s2376_s12 = sphi %s2459_s12, %s3054_s12   ;;  %s2372_s11 = sphi %s2457_s11, %s3050_s11   ;;  %s2368_s10 = sphi %s2455_s10, %s3053_s10   ;;  %s2364_s30 = sphi %s2453_s30, %s3052_s30  }
  0x13   : > { %3013 = sst [smem:[#allocation27_spill]] %s2376_s12  ;;  %s42_s16 = sadd.s32 1, %s2380_s13 }
  0x14   : > { %3014 = sst [smem:[#allocation28_spill]] %s2384_s14  ;;  %p43_p0 = scmp.ge.s32.totalorder %s42_s16, 2 }
  0x15   : > { %3015 = sst [smem:[#allocation29_spill]] %s2482_s15  ;;  %s54_s17 = sadd.s32 1, %s2372_s11 }
  0x16   : > { %p61_p1 = scmp.ne.s32.totalorder %s2372_s11, %s2368_s10  ;;  %p62_p2 = scmp.eq.s32.totalorder %s2384_s14, 0 }
  0x17   : > { %s3057_s16 = smov (%p43_p0, %s42_s16), 0  ;;  %p67_p4 = scmp.ne.s32.totalorder %s2368_s10, %s2364_s30 }
  0x18   : > { %3016 = sst [smem:[#allocation30_spill]] %s3057_s16  ;;  %p2491_p3 = por %p62_p2, %p61_p1 }
  0x19   : > { %s50_s19 = ssub.s32 %s2380_s13, %s3057_s16  ;;  %p2989_p5 = scmp.eq.s32.totalorder %s2482_s15, 0 }
  0x1a   : > { %p52_p6 = scmp.eq.s32.totalorder %s50_s19, 0  ;;  %p1655_p7 = scmp.ge.s32.totalorder %s2384_s14, 1 }
  0x1b   : > { %p2502_p8 = por %p2989_p5, %p67_p4  ;;  %p316_p9 = scmp.lt.s32.totalorder %s2384_s14, 3 }
  0x1c   : > { %s2508_s21 = scalar_select %p52_p6, %s2372_s11, %s54_s17  }
  0x1d   : > { %s3018_s20 = scalar_select %p2502_p8, 1, 0 }
  0x1e   : > { %3019 = sst [smem:[#allocation31_spill]] %s2508_s21  ;;  %p2510_p10 = pnand %p1655_p7, %p316_p9 }
  0x1f   : > { %s2386_s23 = smov [#allocation9]   ;;  %p1856_p12 = scmp.lt.s32.totalorder %s2384_s14, 2 }
  0x20   : > { %s3020_s22 = scalar_select %p2510_p10, 1, 0 }
  0x21   : > { %p1828_p11 = pneg %p2510_p10  ;;  %s332_s24 = sshll.u32 %s2386_s23, 4  ;;  %s333_s24 = int_to_ptr.vmem [resolvable:$true] %s332_s24 }
  0x22   : > { %s2524_s26 = sand.u32 1, %s2372_s11   ;;  %p2528_p0 = pnand %p1856_p12, %p2491_p3 }
  0x23   : > { %p2519_p13 = pnand %p1828_p11, %p2989_p5  ;;  %s2533_s28 = sand.u32 1, %s2384_s14  }
  0x24   : > { %s3022_s27 = scalar_select %p2528_p0, 1, 0 }
  0x25   : > { %s3021_s25 = scalar_select %p2519_p13, 1, 0 }
  0x26   : > { %s3023_s2 = sld [smem:[#allocation32_spill]]  ;;  %p2994_p2 = pneg %p2519_p13 }
  0x2c   : > { %s2048_s17 = scalar_lea.hbm %s3023_s2, 256 }
  0x2d   : > { %p2049_p1 = scmp.ne.s32.totalorder %s3023_s2, %s2048_s17  ;;  %p2055_p3 = scmp.lt.u32.totalorder %s2048_s17, %s3023_s2 }
  0x2f   : > { %p2051_p4 = pnand %p2994_p2, %p2049_p1 }
  0x31   : > { %p2052_p6 = pneg %p2051_p4 }
  0x33   : > { %p2057_p7 = pnand %p2055_p3, %p2052_p6 }
  0x35   : > { %2060 = shalt.err (!%p2057_p7)
}
  0x36   : > { %s2061_s21 = scalar_lea.vmem %s333_s24, 256  ;;  %p2069_p5 = scmp.lt.s32.totalorder %s333_s24, %s333_s24 }
  0x37   : > { %p2062_p9 = scmp.ne.s32.totalorder %s333_s24, %s2061_s21  ;;  %p2070_p8 = scmp.lt.s32.totalorder %s2061_s21, %s2061_s21 }
  0x39   : > { %p2064_p11 = pnand %p2062_p9, %p2994_p2  ;;  %p2071_p10 = por %p2070_p8, %p2069_p5 }
  0x3b   : > { %p2065_p12 = pneg %p2064_p11 }
  0x3d   : > { %p2072_p0 = pnand %p2071_p10, %p2065_p12 }
  0x3f   : > { %2075 = shalt.err (!%p2072_p0)
}
  0x40   : > { %1831 = dma.hbm_to_vmem [thread:$0]  (!%p2519_p13), %s3023_s2, 256, %s333_s24, [#allocation8]  }
  0x41   : > { %s2558_s16 = sshll.u32 %s2524_s26, 7  ;;  %s1664_s17 = sshll.u32 %s2380_s13, 6 }
  0x42   : > { %s3024_s3 = sld [smem:[#allocation33_spill]]  ;;  %s401_s18 = scalar_lea.vmem [#allocation10], %s2558_s16 }
  0x43   : > { %s407_s29 = sshll.u32 %s401_s18, 4  ;;  %p3025_p8 = scmp.ne.s32.totalorder %s3022_s27, 0  ;;  %s2567_s29 = int_to_ptr.vmem [resolvable:$true] %s407_s29 }
  0x45   : > { %p2574_p10 = pneg %p3025_p8 }
  0x47   : > { %s3026_s24 = scalar_select %p2574_p10, 1, 0 }
  0x48   : > { %s2564_s21 = scalar_lea.hbm %s3024_s3, %s1664_s17  ;;  %s2081_s23 = scalar_lea.hbm %s3024_s3, 4096 }
  0x49   : > { %s2076_s11 = scalar_lea.hbm %s2564_s21, 2048  ;;  %p2082_p4 = scmp.lt.u32.totalorder %s2564_s21, %s3024_s3 }
  0x4a   : > { %p2077_p5 = scmp.ne.s32.totalorder %s2564_s21, %s2076_s11  ;;  %p2083_p6 = scmp.lt.u32.totalorder %s2081_s23, %s2076_s11 }
  0x4b   : > { %p2085_p7 = scmp.lt.u32.totalorder %s2076_s11, %s2564_s21 }
  0x4c   : > { %p2079_p0 = pnand %p2574_p10, %p2077_p5  ;;  %p2084_p3 = por %p2083_p6, %p2082_p4 }
  0x4e   : > { %p2080_p1 = pneg %p2079_p0  ;;  %p2086_p9 = por %p2085_p7, %p2084_p3 }
  0x50   : > { %p2087_p11 = pnand %p2086_p9, %p2080_p1 }
  0x52   : > { %2090 = shalt.err (!%p2087_p11)
}
  0x53   : > { %s2091_s30 = scalar_lea.vmem %s2567_s29, 2048  ;;  %s2387_s17 = smov [#allocation10]  }
  0x54   : > { %p2092_p12 = scmp.ne.s32.totalorder %s2567_s29, %s2091_s30  ;;  %s2096_s19 = sshll.u32 %s2387_s17, 4  ;;  %s2097_s19 = int_to_ptr.vmem [resolvable:$false] %s2096_s19 }
  0x55   : > { %s2098_s2 = scalar_lea.vmem %s2097_s19, 4096  ;;  %p2099_p2 = scmp.lt.s32.totalorder %s2567_s29, %s2097_s19 }
  0x56   : > { %p2094_p5 = pnand %p2092_p12, %p2574_p10  ;;  %p2100_p13 = scmp.lt.s32.totalorder %s2098_s2, %s2091_s30 }
  0x58   : > { %p2095_p0 = pneg %p2094_p5  ;;  %p2101_p4 = por %p2100_p13, %p2099_p2 }
  0x5a   : > { %p2102_p6 = pnand %p2101_p4, %p2095_p0 }
  0x5c   : > { %2105 = shalt.err (!%p2102_p6)
}
  0x5d   : > { %s2388_s11 = smov 128   ;;  %s2389_s23 = smov 64  }
  0x5e   : > { %s2390_s18 = smov 4   ;;  %s3027_s17 = scalar_lea.sflag [#allocation11], %s2533_s28 }
  0x5f   : > { %1844 = dma.hbm_to_vmem [thread:$0]  (!%p3025_p8), %s2564_s21, 2048, %s2567_s29, %s3027_s17, %s2388_s11, %s2389_s23, %s2390_s18  }
  0x60   : > { %s1779_s19 = sshll.u32 %s2380_s13, 11  ;;  %s443_s30 = scalar_lea.vmem [#allocation13], %s2558_s16 }
  0x61   : > { %s451_s2 = sshll.u32 %s443_s30, 4  ;;  %s3028_s5 = sld [smem:[#allocation34_spill]]  ;;  %s2607_s2 = int_to_ptr.vmem [resolvable:$true] %s451_s2 }
  0x62   : > { %s2612_s15 = scalar_lea.hbm %s2984_s6, %s1779_s19  ;;  %s3006_s21 = scalar_lea.sflag [#allocation14], %s2533_s28 }
  0x67   : > { %s2605_s9 = scalar_lea.hbm %s3028_s5, %s1779_s19  ;;  %s2111_s23 = scalar_lea.hbm %s3028_s5, 4096 }
  0x68   : > { %s2106_s29 = scalar_lea.hbm %s2605_s9, 2048  ;;  %p2112_p3 = scmp.lt.u32.totalorder %s2605_s9, %s3028_s5 }
  0x69   : > { %p2107_p13 = scmp.ne.s32.totalorder %s2605_s9, %s2106_s29  ;;  %p2113_p7 = scmp.lt.u32.totalorder %s2111_s23, %s2106_s29 }
  0x6a   : > { %p2115_p11 = scmp.lt.u32.totalorder %s2106_s29, %s2605_s9 }
  0x6b   : > { %p2109_p2 = pnand %p2107_p13, %p2574_p10  ;;  %p2114_p9 = por %p2113_p7, %p2112_p3 }
  0x6d   : > { %p2110_p1 = pneg %p2109_p2  ;;  %p2116_p12 = por %p2115_p11, %p2114_p9 }
  0x6f   : > { %p2117_p5 = pnand %p2116_p12, %p2110_p1 }
  0x71   : > { %2120 = shalt.err (!%p2117_p5)
}
  0x72   : > { %s2121_s7 = scalar_lea.vmem %s2607_s2, 2048  ;;  %s2391_s12 = smov [#allocation13]  }
  0x73   : > { %p2122_p0 = scmp.ne.s32.totalorder %s2607_s2, %s2121_s7  ;;  %s2126_s19 = sshll.u32 %s2391_s12, 4  ;;  %s2127_s19 = int_to_ptr.vmem [resolvable:$false] %s2126_s19 }
  0x74   : > { %s2128_s30 = scalar_lea.vmem %s2127_s19, 4096  ;;  %p2129_p13 = scmp.lt.s32.totalorder %s2607_s2, %s2127_s19 }
  0x75   : > { %p2124_p4 = pnand %p2122_p0, %p2574_p10  ;;  %p2130_p2 = scmp.lt.s32.totalorder %s2128_s30, %s2121_s7 }
  0x77   : > { %p2125_p6 = pneg %p2124_p4  ;;  %p2131_p3 = por %p2130_p2, %p2129_p13 }
  0x79   : > { %p2132_p7 = pnand %p2131_p3, %p2125_p6 }
  0x7b   : > { %2135 = shalt.err (!%p2132_p7)
}
  0x7c   : > { %s2392_s29 = smov 8   ;;  %s2393_s3 = smov [#allocation16]  }
  0x7d   : > { %1850 = dma.hbm_to_vmem [thread:$0]  (!%p3025_p8), %s2605_s9, 2048, %s2607_s2, %s3006_s21, %s2388_s11, %s2388_s11, %s2392_s29  }
  0x7e   : > { %s346_s14 = sshll.u32 %s2393_s3, 4  ;;  %s1659_s23 = sshll.u32 %s2524_s26, 3  ;;  %s347_s14 = int_to_ptr.vmem [resolvable:$true] %s346_s14 }
  0x7f   : > { %s2136_s7 = scalar_lea.hbm %s2986_s8, 512  ;;  %p3029_p9 = scmp.ne.s32.totalorder %s3021_s25, 0 }
  0x80   : > { %p2137_p1 = scmp.ne.s32.totalorder %s2986_s8, %s2136_s7  ;;  %p2143_p0 = scmp.lt.u32.totalorder %s2136_s7, %s2986_s8 }
  0x81   : > { %p3030_p11 = pneg %p3029_p9 }
  0x83   : > { %p2139_p12 = pnand %p2137_p1, %p3030_p11 }
  0x85   : > { %p2140_p5 = pneg %p2139_p12 }
  0x87   : > { %p2145_p4 = pnand %p2143_p0, %p2140_p5 }
  0x89   : > { %2148 = shalt.err (!%p2145_p4)
}
  0x8a   : > { %s2149_s9 = scalar_lea.vmem %s347_s14, 512  ;;  %p3031_p13 = pmov %p3030_p11 }
  0x8b   : > { %p2150_p6 = scmp.ne.s32.totalorder %s347_s14, %s2149_s9  ;;  %p2157_p7 = scmp.lt.s32.totalorder %s347_s14, %s347_s14 }
  0x8c   : > { %p2158_p8 = scmp.lt.s32.totalorder %s2149_s9, %s2149_s9 }
  0x8d   : > { %p2152_p2 = pnand %p2150_p6, %p3031_p13 }
  0x8e   : > { %p2159_p10 = por %p2158_p8, %p2157_p7 }
  0x8f   : > { %p2153_p3 = pneg %p2152_p2 }
  0x91   : > { %p2160_p1 = pnand %p2159_p10, %p2153_p3 }
  0x93   : > { %2163 = shalt.err (!%p2160_p1)
}
  0x94   : > { %1834 = dma.hbm_to_vmem [thread:$0]  (!%p3029_p9), %s2986_s8, 512, %s347_s14, [#allocation17]  }
  0x95   : > { %s1660_s5 = sshll.u32 %s2380_s13, 7  ;;  %s361_s18 = scalar_lea.vmem [#allocation4], %s1659_s23 }
  0x96   : > { %s370_s17 = sshll.u32 %s361_s18, 4  ;;  %s2670_s19 = scalar_lea.hbm %s2978_s0, %s1660_s5  ;;  %s371_s17 = int_to_ptr.vmem [resolvable:$true] %s370_s17 }
  0x97   : > { %s358_s25 = scalar_lea.sflag [#allocation5], %s2524_s26  ;;  %s2164_s30 = scalar_lea.hbm %s2670_s19, 128 }
  0x98   : > { %p2165_p8 = scmp.ne.s32.totalorder %s2670_s19, %s2164_s30  ;;  %p3032_p10 = scmp.ne.s32.totalorder %s3026_s24, 0 }
  0x99   : > { %s2169_s2 = scalar_lea.hbm %s2978_s0, 256  ;;  %p2170_p12 = scmp.lt.u32.totalorder %s2670_s19, %s2978_s0 }
  0x9a   : > { %p2167_p9 = pnand %p2165_p8, %p3032_p10  ;;  %p2171_p5 = scmp.lt.u32.totalorder %s2169_s2, %s2164_s30 }
  0x9b   : > { %p2173_p4 = scmp.lt.u32.totalorder %s2164_s30, %s2670_s19 }
  0x9c   : > { %p2168_p11 = pneg %p2167_p9  ;;  %p2172_p0 = por %p2171_p5, %p2170_p12 }
  0x9e   : > { %p2174_p6 = por %p2173_p4, %p2172_p0 }
  0xa0   : > { %p2175_p13 = pnand %p2174_p6, %p2168_p11 }
  0xa2   : > { %2178 = shalt.err (!%p2175_p13)
}
  0xa3   : > { %s2179_s7 = scalar_lea.vmem %s371_s17, 128  ;;  %s2394_s12 = smov [#allocation4]  }
  0xa4   : > { %p2180_p2 = scmp.ne.s32.totalorder %s371_s17, %s2179_s7  ;;  %s2184_s21 = sshll.u32 %s2394_s12, 4  ;;  %s2185_s21 = int_to_ptr.vmem [resolvable:$false] %s2184_s21 }
  0xa5   : > { %s2186_s14 = scalar_lea.vmem %s2185_s21, 256  ;;  %p2187_p1 = scmp.lt.s32.totalorder %s371_s17, %s2185_s21 }
  0xa6   : > { %p2182_p3 = pnand %p2180_p2, %p3032_p10  ;;  %p2188_p8 = scmp.lt.s32.totalorder %s2186_s14, %s2179_s7 }
  0xa8   : > { %p2183_p7 = pneg %p2182_p3  ;;  %p2189_p9 = por %p2188_p8, %p2187_p1 }
  0xaa   : > { %p2190_p5 = pnand %p2189_p9, %p2183_p7 }
  0xac   : > { %2193 = shalt.err (!%p2190_p5)
}
  0xad   : > { %p3033_p12 = scmp.ne.s32.totalorder %s3022_s27, 0  ;;  %s2695_s2 = scalar_lea.hbm %s2979_s1, %s1660_s5 }
  0xae   : > { %s381_s21 = scalar_lea.vmem [#allocation7], %s1659_s23  ;;  %s1665_s18 = sshll.u32 %s2524_s26, 8 }
  0xaf   : > { %1838 = dma.hbm_to_vmem [thread:$0]  (!%p3033_p12), %s2670_s19, 128, %s371_s17, %s358_s25  }
  0xb0   : > { %s390_s3 = sshll.u32 %s381_s21, 4  ;;  %s378_s7 = scalar_lea.sflag [#allocation8], %s2533_s28  ;;  %s2699_s3 = int_to_ptr.vmem [resolvable:$true] %s390_s3 }
  0xb1   : > { %s2194_s12 = scalar_lea.hbm %s2695_s2, 128  ;;  %s2199_s5 = scalar_lea.hbm %s2979_s1, 256 }
  0xb2   : > { %p2195_p11 = scmp.ne.s32.totalorder %s2695_s2, %s2194_s12  ;;  %p2200_p6 = scmp.lt.u32.totalorder %s2695_s2, %s2979_s1 }
  0xb3   : > { %p2201_p13 = scmp.lt.u32.totalorder %s2199_s5, %s2194_s12  ;;  %p2203_p3 = scmp.lt.u32.totalorder %s2194_s12, %s2695_s2 }
  0xb4   : > { %p2197_p0 = pnand %p2195_p11, %p3032_p10 }
  0xb5   : > { %p2202_p2 = por %p2201_p13, %p2200_p6 }
  0xb6   : > { %p2198_p4 = pneg %p2197_p0 }
  0xb7   : > { %p2204_p7 = por %p2203_p3, %p2202_p2 }
  0xb9   : > { %p2205_p1 = pnand %p2204_p7, %p2198_p4 }
  0xbb   : > { %2208 = shalt.err (!%p2205_p1)
}
  0xbc   : > { %s2209_s23 = scalar_lea.vmem %s2699_s3, 128  ;;  %s2395_s30 = smov [#allocation7]  }
  0xbd   : > { %p2210_p8 = scmp.ne.s32.totalorder %s2699_s3, %s2209_s23  ;;  %s2214_s9 = sshll.u32 %s2395_s30, 4  ;;  %s2215_s9 = int_to_ptr.vmem [resolvable:$false] %s2214_s9 }
  0xbe   : > { %s2216_s21 = scalar_lea.vmem %s2215_s9, 256  ;;  %p2217_p11 = scmp.lt.s32.totalorder %s2699_s3, %s2215_s9 }
  0xbf   : > { %p2212_p9 = pnand %p2210_p8, %p3032_p10  ;;  %p2218_p0 = scmp.lt.s32.totalorder %s2216_s21, %s2209_s23 }
  0xc1   : > { %p2213_p5 = pneg %p2212_p9  ;;  %p2219_p6 = por %p2218_p0, %p2217_p11 }
  0xc3   : > { %p2220_p13 = pnand %p2219_p6, %p2213_p5 }
  0xc5   : > { %2223 = shalt.err (!%p2220_p13)
}
  0xc6   : > { %1841 = dma.hbm_to_vmem [thread:$0]  (!%p3033_p12), %s2695_s2, 128, %s2699_s3, %s378_s7  }
  0xc7   : > { %s1777_s12 = sshll.u32 %s2380_s13, 12  ;;  %s421_s25 = scalar_lea.vmem [#allocation12], %s1665_s18 }
  0xc8   : > { %s2728_s5 = scalar_lea.hbm %s2982_s4, %s1777_s12  ;;  %s429_s14 = sshll.u32 %s421_s25, 4  ;;  %s2732_s14 = int_to_ptr.vmem [resolvable:$true] %s429_s14 }
  0xc9   : > { %s2224_s23 = scalar_lea.hbm %s2728_s5, 4096  ;;  %s2229_s7 = scalar_lea.hbm %s2982_s4, 8192 }
  0xca   : > { %p2225_p4 = scmp.ne.s32.totalorder %s2728_s5, %s2224_s23  ;;  %p2230_p7 = scmp.lt.u32.totalorder %s2728_s5, %s2982_s4 }
  0xcb   : > { %p2231_p1 = scmp.lt.u32.totalorder %s2229_s7, %s2224_s23  ;;  %p2233_p9 = scmp.lt.u32.totalorder %s2224_s23, %s2728_s5 }
  0xcc   : > { %p2227_p2 = pnand %p2225_p4, %p3032_p10 }
  0xcd   : > { %p2232_p8 = por %p2231_p1, %p2230_p7 }
  0xce   : > { %p2228_p3 = pneg %p2227_p2 }
  0xcf   : > { %p2234_p5 = por %p2233_p9, %p2232_p8 }
  0xd1   : > { %p2235_p11 = pnand %p2234_p5, %p2228_p3 }
  0xd3   : > { %2238 = shalt.err (!%p2235_p11)
}
  0xd4   : > { %s2239_s26 = scalar_lea.vmem %s2732_s14, 4096  ;;  %s2396_s18 = smov [#allocation12]  }
  0xd5   : > { %p2240_p0 = scmp.ne.s32.totalorder %s2732_s14, %s2239_s26  ;;  %s2244_s21 = sshll.u32 %s2396_s18, 4  ;;  %s2245_s21 = int_to_ptr.vmem [resolvable:$false] %s2244_s21 }
  0xd6   : > { %s2246_s12 = scalar_lea.vmem %s2245_s21, 8192  ;;  %p2247_p4 = scmp.lt.s32.totalorder %s2732_s14, %s2245_s21 }
  0xd7   : > { %p2242_p6 = pnand %p2240_p0, %p3032_p10  ;;  %p2248_p2 = scmp.lt.s32.totalorder %s2246_s12, %s2239_s26 }
  0xd9   : > { %p2243_p13 = pneg %p2242_p6  ;;  %p2249_p7 = por %p2248_p2, %p2247_p4 }
  0xdb   : > { %p2250_p1 = pnand %p2249_p7, %p2243_p13 }
  0xdd   : > { %2253 = shalt.err (!%p2250_p1)
}
  0xde   : > { %s2397_s17 = smov 256   ;;  %s2398_s19 = smov 16  }
  0xdf   : > { %s3034_s25 = scalar_lea.sflag [#allocation11], %s2533_s28  ;;  %s465_s23 = scalar_lea.vmem [#allocation15], %s2558_s16 }
  0xe0   : > { %1847 = dma.hbm_to_vmem [thread:$0]  (!%p3033_p12), %s2728_s5, 4096, %s2732_s14, %s3034_s25, %s2397_s17, %s2397_s17, %s2398_s19  }
  0xe1   : > { %s473_s2 = sshll.u32 %s465_s23, 4  ;;  %s2254_s3 = scalar_lea.hbm %s2612_s15, 2048  ;;  %s2758_s2 = int_to_ptr.vmem [resolvable:$true] %s473_s2 }
  0xe2   : > { %p2255_p3 = scmp.ne.s32.totalorder %s2612_s15, %s2254_s3  ;;  %s2259_s9 = scalar_lea.hbm %s2984_s6, 4096 }
  0xe3   : > { %p2260_p5 = scmp.lt.u32.totalorder %s2612_s15, %s2984_s6  ;;  %p2261_p11 = scmp.lt.u32.totalorder %s2259_s9, %s2254_s3 }
  0xe4   : > { %p2257_p8 = pnand %p2255_p3, %p3032_p10  ;;  %p2263_p6 = scmp.lt.u32.totalorder %s2254_s3, %s2612_s15 }
  0xe5   : > { %p2262_p0 = por %p2261_p11, %p2260_p5 }
  0xe6   : > { %p2258_p9 = pneg %p2257_p8 }
  0xe7   : > { %p2264_p13 = por %p2263_p6, %p2262_p0 }
  0xe9   : > { %p2265_p4 = pnand %p2264_p13, %p2258_p9 }
  0xeb   : > { %2268 = shalt.err (!%p2265_p4)
}
  0xec   : > { %s2269_s16 = scalar_lea.vmem %s2758_s2, 2048  ;;  %s2399_s5 = smov [#allocation15]  }
  0xed   : > { %p2270_p2 = scmp.ne.s32.totalorder %s2758_s2, %s2269_s16  ;;  %s2274_s14 = sshll.u32 %s2399_s5, 4  ;;  %s2275_s14 = int_to_ptr.vmem [resolvable:$false] %s2274_s14 }
  0xee   : > { %s2276_s21 = scalar_lea.vmem %s2275_s14, 4096  ;;  %p2277_p3 = scmp.lt.s32.totalorder %s2758_s2, %s2275_s14 }
  0xef   : > { %p2272_p7 = pnand %p2270_p2, %p3032_p10  ;;  %p2278_p8 = scmp.lt.s32.totalorder %s2276_s21, %s2269_s16 }
  0xf1   : > { %p2273_p1 = pneg %p2272_p7  ;;  %p2279_p5 = por %p2278_p8, %p2277_p3 }
  0xf3   : > { %p2280_p11 = pnand %p2279_p5, %p2273_p1 }
  0xf5   : > { %2283 = shalt.err (!%p2280_p11)
}
  0xf6   : > { %s3035_s12 = scalar_lea.sflag [#allocation14], %s2533_s28  ;;  %p3036_p10 = scmp.ne.s32.totalorder %s3020_s22, 0 }
  0xf7   : > { %1853 = dma.hbm_to_vmem [thread:$0]  (!%p3033_p12), %s2612_s15, 2048, %s2758_s2, %s3035_s12, %s2388_s11, %s2388_s11, %s2392_s29  }
  0xf8   : > { %496 = sbr.rel (%p3036_p10) target bundleno = 856 (0x358), region = 56  ;;  %s498_s24 = sand.u32 (!%p3036_p10), 1, %s2368_s10  }
  0xf9   : > { %s1678_s17 = sshll.u32 (!%p3036_p10), %s498_s24, 3  ;;  %s499_s19 = scalar_lea.sflag (!%p3036_p10), [#allocation5], %s498_s24 }
  0xfa   : > { %s2789_s25 = scalar_lea.vmem (!%p3036_p10), [#allocation4], %s1678_s17  ;;  %p3037_p9 = scmp.ne.s32.totalorder (!%p3036_p10), %s3018_s20, 0 }
  0xff   : > { %2335 = dma.done.wait (%p3037_p9), %s499_s19, 128  }
 0x100   : > { %2337 = vsyncadd (%p3037_p9), %s499_s19, 4294967168  ;;  %s3038_s27 = sld [smem:[#allocation29_spill]]  ;;  %s2796_s15 = scalar_lea.vmem [#allocation7], %s1678_s17 }
 0x106   : > { %s507_s28 = sand.u32 1, %s3038_s27  }
 0x107   : > { %s508_s23 = scalar_lea.sflag [#allocation8], %s507_s28 }
 0x108   : > { %2339 = dma.done.wait (%p3037_p9), %s508_s23, 128  }
 0x109   : > { %2341 = vsyncadd (%p3037_p9), %s508_s23, 4294967168  ;;  %p3039_p12 = scmp.eq.s32.totalorder %s3038_s27, 0 }
 0x10b   : > { %2343 = dma.done.wait (%p3039_p12), [#allocation8], 256   ;;  %p3040_p0 = pmov %p3039_p12 }
 0x10c   : > { %s1681_s22 = sshll.u32 %s498_s24, 7  ;;  %s521_s11 = scalar_lea.sflag [#allocation11], %s507_s28 }
 0x10d   : > { %2345 = vsyncadd (%p3040_p0), [#allocation8], 4294967040  ;;  %s2806_s29 = scalar_lea.vmem [#allocation10], %s1681_s22 }
 0x10e   : > { %2347 = dma.done.wait (%p3037_p9), %s521_s11, 6144  }
 0x10f   : > { %2349 = vsyncadd (%p3037_p9), %s521_s11, 4294961152  ;;  %s1682_s2 = sshll.u32 %s498_s24, 8  ;;  %s539_s7 = scalar_lea.sflag [#allocation14], %s507_s28 }
 0x110   : > { %s2812_s3 = scalar_lea.vmem [#allocation12], %s1682_s2  ;;  %s2814_s30 = scalar_lea.vmem [#allocation13], %s1681_s22 }
 0x111   : > { %2351 = dma.done.wait (%p3037_p9), %s539_s7, 4096  }
 0x112   : > { %2353 = vsyncadd (%p3037_p9), %s539_s7, 4294963200  ;;  %s2820_s9 = scalar_lea.vmem [#allocation15], %s1681_s22  ;;  %p3041_p6 = pmov %p3040_p0 }
 0x113   : > { %p3042_p13 = pmov %p3040_p0 }
 0x114   : > { %2355 = dma.done.wait (%p3041_p6), [#allocation17], 512  }
 0x115   : > { %2357 = vsyncadd (%p3042_p13), [#allocation17], 4294966784  ;;  %s3043_s26 = sld [smem:[#allocation27_spill]]  ;;  %s3044_s21 = sld [smem:[#allocation35_spill]] }
 0x11b   : > { %p623_p4 = scmp.lt.s32.totalorder %s3043_s26, 1  ;;  %p1687_p2 = scmp.ne.s32.totalorder %s3043_s26, 0 }
 0x11c   : > { %v2400_v0 = vmov (!%p1687_p2), 0.0  }
 0x11d   : > { %s624_s18 = scalar_select %p623_p4, %s3043_s26, 1 }
 0x11e   : > { %633 = sbr.rel (%p1687_p2) target bundleno = 293 (0x125), region = 92  ;;  %634 = vst [vmem:[#allocation2] sm:$0xff] (!%p1687_p2), %v2400_v0  ;;  %635 = vst [vmem:[#allocation2 + $0x8] sm:$0xff] (!%p1687_p2), %v2400_v0 }
 0x11f   : > { %s1686_s16 = sshll.u32 %s624_s18, 3  ;;  %636 = vst [vmem:[#allocation3] sm:$0xff] (!%p1687_p2), %v2400_v0  ;;  %637 = vst [vmem:[#allocation3 + $0x8] sm:$0xff] (!%p1687_p2), %v2400_v0 }
 0x120   : > { %s2831_s12 = scalar_lea.vmem %s3044_s21, %s1686_s16 }
 0x125 PF: > { %v1920_v1 = vld [vmem:[%s2806_s29 + $0x40] sm:$0xff]   ;;  %v2401_v3 = vmov 0   ;;  %v1922_v4 = vld [vmem:[%s2806_s29 + $0x48] sm:$0xff]   ;;  %v1924_v6 = vld [vmem:[%s2806_s29 + $0x50] sm:$0xff]   ;;  %s3045_s20 = sld [smem:[#allocation27_spill]] }
 0x126   : > { %v1921_v2 = vld [vmem:[%s2806_s29] sm:$0xff]   ;;  %1048 = vmatprep.mubr.bf16.mxu1 %v2401_v3  ;;  %1782 = vmatprep.subr.bf16.mxu0 %v1920_v1  ;;  %v1923_v5 = vld [vmem:[%s2806_s29 + $0x8] sm:$0xff]   ;;  %v1925_v7 = vld [vmem:[%s2806_s29 + $0x10] sm:$0xff]  }
 0x127   : > { %1783 = vmatpush3.bf16.msra.mxu0 %v1921_v2  ;;  %v1926_v8 = vld [vmem:[%s2806_s29 + $0x58] sm:$0xff]   ;;  %v1928_v10 = vld [vmem:[%s2806_s29 + $0x60] sm:$0xff]   ;;  %v1930_v12 = vld [vmem:[%s2806_s29 + $0x68] sm:$0xff]  }
 0x128   : > { %1784 = vmatprep.subr.bf16.mxu0 %v1922_v4  ;;  %v1927_v9 = vld [vmem:[%s2806_s29 + $0x18] sm:$0xff]   ;;  %v1929_v11 = vld [vmem:[%s2806_s29 + $0x20] sm:$0xff]   ;;  %v1931_v18 = vld [vmem:[%s2806_s29 + $0x28] sm:$0xff]  }
 0x129   : > { %v2846_v13 = vld [vmem:[#allocation9 + $0x8] sm:$0xff]  ;;  %v1936_v15 = vld [vmem:[%s2812_s3 + $0x4] ss:$16 sps:$4 sm:$0xff]   ;;  %v1938_v16 = vld [vmem:[%s2812_s3] ss:$16 sps:$4 sm:$0xff]  }
 0x12a   : > { %v643_v14 = vpack.c.bf16 %v2846_v13, %v2846_v13  ;;  %v1939_v17 = vld [vmem:[%s2812_s3 + $0x24] ss:$16 sps:$4 sm:$0xff]   ;;  %1016 = vmatprep.subr.bf16.mxu1 %v1936_v15  ;;  %v1941_v20 = vld [vmem:[%s2812_s3 + $0x20] ss:$16 sps:$4 sm:$0xff]   ;;  %v1934_v23 = vld [vmem:[%s2806_s29 + $0x78] sm:$0xff]  }
 0x12b   : > { %1785 = vmatpush3.bf16.msra.mxu0 %v1923_v5  ;;  %v1932_v19 = vld [vmem:[%s2806_s29 + $0x70] sm:$0xff]   ;;  %1017 = vmatpush1.bf16.msra.mxu1 %v1938_v16  ;;  %v1935_v24 = vld [vmem:[%s2806_s29 + $0x38] sm:$0xff]   ;;  %v1965_v46 = vld [vmem:[%s2814_s30 + $0x4] ss:$8 sps:$4 sm:$0xff]   ;;  %p1769_p7 = scmp.ne.s32.totalorder %s3045_s20, 1 }
 0x12c   : > { %1786 = vmatprep.subr.bf16.mxu0 %v1924_v6  ;;  %804 = vmatprep.mubr.bf16.mxu0 %v643_v14  ;;  %v1942_v21 = vld [vmem:[%s2812_s3 + $0x44] ss:$16 sps:$4 sm:$0xff]   ;;  %v1944_v25 = vld [vmem:[%s2812_s3 + $0x40] ss:$16 sps:$4 sm:$0xff]   ;;  %v1962_v28 = vld [vmem:[%s2812_s3 + $0xc] ss:$16 sps:$4 sm:$0xff]  }
 0x12d   : > { %1018 = vmatprep.subr.bf16.mxu1 %v1939_v17  ;;  %v1933_v22 = vld [vmem:[%s2806_s29 + $0x30] sm:$0xff]   ;;  %v1960_v32 = vld [vmem:[%s2812_s3 + $0x8] ss:$16 sps:$4 sm:$0xff]   ;;  %v1968_v33 = vld [vmem:[%s2812_s3 + $0x2c] ss:$16 sps:$4 sm:$0xff]  }
 0x12e   : > { %v1945_v26 = vld [vmem:[%s2812_s3 + $0x64] ss:$16 sps:$4 sm:$0xff]   ;;  %v1947_v29 = vld [vmem:[%s2812_s3 + $0x60] ss:$16 sps:$4 sm:$0xff]   ;;  %v1966_v36 = vld [vmem:[%s2812_s3 + $0x28] ss:$16 sps:$4 sm:$0xff]  }
 0x12f   : > { %1787 = vmatpush3.bf16.msra.mxu0 %v1925_v7  ;;  %1019 = vmatpush1.bf16.msra.mxu1 %v1941_v20  ;;  %v2862_v27 = vld [vmem:[#allocation9] sm:$0xff]  ;;  %v1974_v37 = vld [vmem:[%s2812_s3 + $0x4c] ss:$16 sps:$4 sm:$0xff]   ;;  %v1972_v40 = vld [vmem:[%s2812_s3 + $0x48] ss:$16 sps:$4 sm:$0xff]  }
 0x130   : > { %1788 = vmatprep.subr.bf16.mxu0 %v1926_v8  ;;  %1020 = vmatprep.subr.bf16.mxu1 %v1942_v21  ;;  %v642_v30 = vpack.c.bf16 %v2862_v27, %v2862_v27  ;;  %v1948_v31 = vld [vmem:[%s2812_s3 + $0x84] ss:$16 sps:$4 sm:$0xff]   ;;  %v1950_v34 = vld [vmem:[%s2812_s3 + $0x80] ss:$16 sps:$4 sm:$0xff]   ;;  %v1980_v41 = vld [vmem:[%s2812_s3 + $0x6c] ss:$16 sps:$4 sm:$0xff]  }
 0x131   : > { %v1951_v35 = vld [vmem:[%s2812_s3 + $0xa4] ss:$16 sps:$4 sm:$0xff]   ;;  %v1953_v38 = vld [vmem:[%s2812_s3 + $0xa0] ss:$16 sps:$4 sm:$0xff]   ;;  %v1978_v45 = vld [vmem:[%s2812_s3 + $0x68] ss:$16 sps:$4 sm:$0xff]  }
 0x132   : > { %v1954_v39 = vld [vmem:[%s2812_s3 + $0xc4] ss:$16 sps:$4 sm:$0xff]   ;;  %v1956_v42 = vld [vmem:[%s2812_s3 + $0xc0] ss:$16 sps:$4 sm:$0xff]   ;;  %v1986_v48 = vld [vmem:[%s2812_s3 + $0x8c] ss:$16 sps:$4 sm:$0xff]  }
 0x133   : > { %1789 = vmatpush3.bf16.msra.mxu0 %v1927_v9  ;;  %1021 = vmatpush1.bf16.msra.mxu1 %v1944_v25  ;;  %v1957_v43 = vld [vmem:[%s2812_s3 + $0xe4] ss:$16 sps:$4 sm:$0xff]   ;;  %v1959_v44 = vld [vmem:[%s2812_s3 + $0xe0] ss:$16 sps:$4 sm:$0xff]   ;;  %v1984_v49 = vld [vmem:[%s2812_s3 + $0x88] ss:$16 sps:$4 sm:$0xff]  }
 0x134   : > { %1790 = vmatprep.subr.bf16.mxu0 %v1928_v10  ;;  %1022 = vmatprep.subr.bf16.mxu1 %v1945_v26  ;;  %v2886_v47 = vld [vmem:[%s2789_s25] sm:$0xff]  ;;  %v1963_v51 = vld [vmem:[%s2814_s30] ss:$8 sps:$4 sm:$0xff]   ;;  %v1977_v57 = vld [vmem:[%s2814_s30 + $0x24] ss:$8 sps:$4 sm:$0xff]  }
 0x135   : > { %v1992_v50 = vld [vmem:[%s2812_s3 + $0xac] ss:$16 sps:$4 sm:$0xff]   ;;  %v823_v52 = vpack.c.bf16 %v2886_v47, %v2886_v47  ;;  %v1990_v54 = vld [vmem:[%s2812_s3 + $0xa8] ss:$16 sps:$4 sm:$0xff]  }
 0x136   : > { %v1971_v53 = vld [vmem:[%s2814_s30 + $0x14] ss:$8 sps:$4 sm:$0xff]   ;;  %v1969_v56 = vld [vmem:[%s2814_s30 + $0x10] ss:$8 sps:$4 sm:$0xff]   ;;  %v1975_v59 = vld [vmem:[%s2814_s30 + $0x20] ss:$8 sps:$4 sm:$0xff]  }
 0x137   : > { %1791 = vmatpush3.bf16.msra.mxu0 %v1929_v11  ;;  %1023 = vmatpush1.bf16.msra.mxu1 %v1947_v29  ;;  %v1998_v55 = vld [vmem:[%s2812_s3 + $0xcc] ss:$16 sps:$4 sm:$0xff]   ;;  %v1996_v58 = vld [vmem:[%s2812_s3 + $0xc8] ss:$16 sps:$4 sm:$0xff]  }
 0x138   : > { %1792 = vmatprep.subr.bf16.mxu0 %v1930_v12  ;;  %1024 = vmatprep.subr.bf16.mxu1 %v1948_v31  ;;  %v1983_v60 = vld [vmem:[%s2814_s30 + $0x34] ss:$8 sps:$4 sm:$0xff]   ;;  %v1981_v61 = vld [vmem:[%s2814_s30 + $0x30] ss:$8 sps:$4 sm:$0xff]   ;;  %v1989_v62 = vld [vmem:[%s2814_s30 + $0x44] ss:$8 sps:$4 sm:$0xff]  }
 0x139   : > { %v1987_v63 = vld [vmem:[%s2814_s30 + $0x40] ss:$8 sps:$4 sm:$0xff]   ;;  %v1995_v0 = vld [vmem:[%s2814_s30 + $0x54] ss:$8 sps:$4 sm:$0xff]   ;;  %v1993_v1 = vld [vmem:[%s2814_s30 + $0x50] ss:$8 sps:$4 sm:$0xff]  }
 0x13a   : > { %v2001_v2 = vld [vmem:[%s2814_s30 + $0x64] ss:$8 sps:$4 sm:$0xff]   ;;  %v1999_v4 = vld [vmem:[%s2814_s30 + $0x60] ss:$8 sps:$4 sm:$0xff]   ;;  %v2007_v7 = vld [vmem:[%s2814_s30 + $0x74] ss:$8 sps:$4 sm:$0xff]  }
 0x13b   : > { %1793 = vmatpush3.bf16.msra.mxu0 %v1931_v18  ;;  %1025 = vmatpush1.bf16.msra.mxu1 %v1950_v34  ;;  %v2004_v5 = vld [vmem:[%s2812_s3 + $0xec] ss:$16 sps:$4 sm:$0xff]   ;;  %v2002_v6 = vld [vmem:[%s2812_s3 + $0xe8] ss:$16 sps:$4 sm:$0xff]  }
 0x13c   : > { %1794 = vmatprep.subr.bf16.mxu0 %v1932_v19  ;;  %1026 = vmatprep.subr.bf16.mxu1 %v1951_v35  ;;  %v2005_v8 = vld [vmem:[%s2814_s30 + $0x70] ss:$8 sps:$4 sm:$0xff]   ;;  %v639_v9 = vld [vmem:[%s2796_s15] sm:$0xff]  ;;  %v2013_v14 = vld [vmem:[%s2820_s9 + $0x14] ss:$8 sps:$4 sm:$0xff]  }
 0x13d   : > { %v1100_v10 = vpack.c.bf16 %v639_v9, %v639_v9  ;;  %v2010_v11 = vld [vmem:[%s2820_s9 + $0x4] ss:$8 sps:$4 sm:$0xff]   ;;  %v2008_v12 = vld [vmem:[%s2820_s9] ss:$8 sps:$4 sm:$0xff]   ;;  %v2011_v15 = vld [vmem:[%s2820_s9 + $0x10] ss:$8 sps:$4 sm:$0xff]  }
 0x13e   : > { %v2016_v16 = vld [vmem:[%s2820_s9 + $0x24] ss:$8 sps:$4 sm:$0xff]   ;;  %v2014_v17 = vld [vmem:[%s2820_s9 + $0x20] ss:$8 sps:$4 sm:$0xff]   ;;  %v2019_v18 = vld [vmem:[%s2820_s9 + $0x34] ss:$8 sps:$4 sm:$0xff]  }
 0x13f   : > { %1795 = vmatpush3.bf16.msra.mxu0 %v1933_v22  ;;  %1027 = vmatpush1.bf16.msra.mxu1 %v1953_v38  ;;  %v2022_v19 = vld [vmem:[%s2820_s9 + $0x44] ss:$8 sps:$4 sm:$0xff]   ;;  %v2020_v20 = vld [vmem:[%s2820_s9 + $0x40] ss:$8 sps:$4 sm:$0xff]   ;;  %v2023_v21 = vld [vmem:[%s2820_s9 + $0x50] ss:$8 sps:$4 sm:$0xff]  }
 0x140   : > { %1796 = vmatprep.subr.bf16.mxu0 %v1934_v23  ;;  %1028 = vmatprep.subr.bf16.mxu1 %v1954_v39  ;;  %v2025_v22 = vld [vmem:[%s2820_s9 + $0x54] ss:$8 sps:$4 sm:$0xff]   ;;  %v2028_v23 = vld [vmem:[%s2820_s9 + $0x64] ss:$8 sps:$4 sm:$0xff]   ;;  %v2029_v26 = vld [vmem:[%s2820_s9 + $0x70] ss:$8 sps:$4 sm:$0xff]  }
 0x141   : > { %v2031_v25 = vld [vmem:[%s2820_s9 + $0x74] ss:$8 sps:$4 sm:$0xff]  }
 0x143   : > { %1797 = vmatpush3.bf16.msra.mxu0 %v1935_v24  ;;  %1029 = vmatpush1.bf16.msra.mxu1 %v1956_v42  ;;  %v2026_v24 = vld [vmem:[%s2820_s9 + $0x60] ss:$8 sps:$4 sm:$0xff]  }
 0x144   : > { %1057 = vmatprep.subr.bf16.mxu0 %v1962_v28  ;;  %1030 = vmatprep.subr.bf16.mxu1 %v1957_v43 }
 0x146   : > { %805 = vmatmul.mubr.bf16.vlgmr.msra.gmra.mrb[0].mxu0 %v642_v30 }
 0x147   : > { %1058 = vmatpush1.bf16.msra.mxu0 %v1960_v32  ;;  %1089 = vmatprep.mubr.bf16.mxu0 %v2401_v3  ;;  %v813_v32 = vld [vmem:[%s2831_s12] sm:$0xff] }
 0x148   : > { %1059 = vmatprep.subr.bf16.mxu0 %v1968_v33  ;;  %1031 = vmatpush1.bf16.msra.mxu1 %v1959_v44 }
 0x149   : > { %1197 = vmatprep.subr.bf16.mxu1 %v1965_v46 }
 0x14b   : > { %1060 = vmatpush1.bf16.msra.mxu0 %v1966_v36  ;;  %1049 = vmatmul.mubr.bf16.vlgmr.msra.gmra.mrb[0].mxu1 %v823_v52 }
 0x14c   : > { %1061 = vmatprep.subr.bf16.mxu0 %v1974_v37  ;;  %1198 = vmatpush1.bf16.msra.mxu1 %v1963_v51 }
 0x14d   : > { %1229 = vmatprep.mubr.bf16.mxu1 %v2401_v3  ;;  %1199 = vmatprep.subr.bf16.mxu1 %v1971_v53  ;;  %v1099_v53 = vld [vmem:[#allocation2 + $0x8] sm:$0xff] }
 0x14f   : > { %1062 = vmatpush1.bf16.msra.mxu0 %v1972_v40 }
 0x150   : > { %1063 = vmatprep.subr.bf16.mxu0 %v1980_v41  ;;  %1200 = vmatpush1.bf16.msra.mxu1 %v1969_v56 }
 0x151   : > { %1201 = vmatprep.subr.bf16.mxu1 %v1977_v57 }
 0x153   : > { %1064 = vmatpush1.bf16.msra.mxu0 %v1978_v45 }
 0x154   : > { %1065 = vmatprep.subr.bf16.mxu0 %v1986_v48  ;;  %1202 = vmatpush1.bf16.msra.mxu1 %v1975_v59 }
 0x155   : > { %1203 = vmatprep.subr.bf16.mxu1 %v1983_v60  ;;  %v1244_v60 = vld [vmem:[#allocation3] sm:$0xff] }
 0x157   : > { %1066 = vmatpush1.bf16.msra.mxu0 %v1984_v49 }
 0x158   : > { %1067 = vmatprep.subr.bf16.mxu0 %v1992_v50  ;;  %1204 = vmatpush1.bf16.msra.mxu1 %v1981_v61  ;;  %v1098_v50 = vld [vmem:[#allocation2] sm:$0xff] }
 0x159   : > { %1205 = vmatprep.subr.bf16.mxu1 %v1989_v62 }
 0x15b   : > { %1068 = vmatpush1.bf16.msra.mxu0 %v1990_v54 }
 0x15c   : > { %1069 = vmatprep.subr.bf16.mxu0 %v1998_v55  ;;  %1206 = vmatpush1.bf16.msra.mxu1 %v1987_v63  ;;  %v1245_v63 = vld [vmem:[#allocation3 + $0x8] sm:$0xff] }
 0x15d   : > { %1207 = vmatprep.subr.bf16.mxu1 %v1995_v0 }
 0x15f   : > { %1070 = vmatpush1.bf16.msra.mxu0 %v1996_v58 }
 0x160   : > { %1208 = vmatpush1.bf16.msra.mxu1 %v1993_v1  ;;  %1071 = vmatprep.subr.bf16.mxu0 %v2004_v5 }
 0x161   : > { %1209 = vmatprep.subr.bf16.mxu1 %v2001_v2 }
 0x163   : > { %1072 = vmatpush1.bf16.msra.mxu0 %v2002_v6 }
 0x164   : > { %1210 = vmatpush1.bf16.msra.mxu1 %v1999_v4  ;;  %1342 = vmatprep.subr.bf16.mxu0 %v2010_v11 }
 0x165   : > { %1211 = vmatprep.subr.bf16.mxu1 %v2007_v7  ;;  %v1393_v7 = vld [vmem:[#allocation16] sm:$0xff] (!%p1769_p7) }
 0x166   : > { %1090 = vmatmul.mubr.bf16.vlgmr.msra.gmra.mrb[4].mxu0 %v823_v52 }
 0x167   : > { %1374 = vmatprep.mubr.bf16.mxu0 %v2401_v3  ;;  %1343 = vmatpush1.bf16.msra.mxu0 %v2008_v12  ;;  %v2017_v3 = vld [vmem:[%s2820_s9 + $0x30] ss:$8 sps:$4 sm:$0xff]  }
 0x168   : > { %1212 = vmatpush1.bf16.msra.mxu1 %v2005_v8  ;;  %1344 = vmatprep.subr.bf16.mxu0 %v2013_v14 }
 0x16b   : > { %1230 = vmatmul.mubr.bf16.vlgmr.msra.gmra.mrb[4].mxu1 %v1100_v10  ;;  %1345 = vmatpush1.bf16.msra.mxu0 %v2011_v15  ;;  %v1394_v10 = vld [vmem:[#allocation16 + $0x8] sm:$0xff] (!%p1769_p7) }
 0x16c   : > { %1346 = vmatprep.subr.bf16.mxu0 %v2016_v16  ;;  %v1395_v16 = vld [vmem:[#allocation16 + $0x10] sm:$0xff] (!%p1769_p7) }
 0x16f   : > { %1347 = vmatpush1.bf16.msra.mxu0 %v2014_v17 }
 0x170   : > { %1348 = vmatprep.subr.bf16.mxu0 %v2019_v18  ;;  %v1396_v18 = vld [vmem:[#allocation16 + $0x18] sm:$0xff] (!%p1769_p7) }
 0x173   : > { %1349 = vmatpush1.bf16.msra.mxu0 %v2017_v3 }
 0x174   : > { %1350 = vmatprep.subr.bf16.mxu0 %v2022_v19 }
 0x177   : > { %1351 = vmatpush1.bf16.msra.mxu0 %v2020_v20 }
 0x178   : > { %1352 = vmatprep.subr.bf16.mxu0 %v2025_v22 }
 0x17b   : > { %1353 = vmatpush1.bf16.msra.mxu0 %v2023_v21 }
 0x17c   : > { %1354 = vmatprep.subr.bf16.mxu0 %v2028_v23 }
 0x17f   : > { %1355 = vmatpush1.bf16.msra.mxu0 %v2026_v24 }
 0x180   : > { %1356 = vmatprep.subr.bf16.mxu0 %v2031_v25 }
 0x183   : > { %1357 = vmatpush1.bf16.msra.mxu0 %v2029_v26 }
 0x219   : > { %v1798_v28 = vpop.f32.mrb[0].mxu0 }
 0x21a   : > { %v1799_v29 = vpop.f32.mrb[1].mxu0 }
 0x21b   : > { %v1800_v30 = vadd.f32 %v1799_v29, %v1798_v28  ;;  %v1801_v31 = vpop.f32.mrb[2].mxu0 }
 0x21c   : > { %v1802_v33 = vpop.f32.mrb[3].mxu0 }
 0x21d   : > { %v812_v34 = vadd.f32 %v1800_v30, %v2886_v47 }
 0x21e   : > { %v1050_v37 = vpop.f32.mrb[0].mxu1 }
 0x21f   : > { %v814_v35 = vadd.f32 %v813_v32, %v812_v34  ;;  %v1052_v38 = vpop.f32.mrb[1].mxu1 }
 0x220   : > { %v1054_v40 = vpop.f32.mrb[2].mxu1 }
 0x221   : > { %v1704_v36 = vmul.f32 -1.442695, %v814_v35  ;;  %v1055_v42 = vpop.f32.mrb[3].mxu1 }
 0x223   : > { %2032 = vpow2.f32 %v1704_v36 }
 0x22d   : > { %v2033_v39 = vpop.eup %2032 }
 0x22e   : > { %v818_v41 = vadd.f32 1.0, %v2033_v39 }
 0x230   : > { %2034 = vrcp.f32 %v818_v41 }
 0x239   : > { %v1091_v46 = vpop.f32.mrb[4].mxu0 }
 0x23a   : > { %v2035_v43 = vpop.eup %2034  ;;  %v1093_v48 = vpop.f32.mrb[5].mxu0 }
 0x23b   : > { %v821_v44 = vmul.f32 %v2035_v43, %v639_v9  ;;  %v1095_v49 = vpop.f32.mrb[6].mxu0 }
 0x23c   : > { %v1096_v52 = vpop.f32.mrb[7].mxu0 }
 0x23d   : > { %v822_v45 = vpack.c.bf16 %v821_v44, %v821_v44 }
 0x23e   : > { %v1231_v51 = vpop.f32.mrb[4].mxu1 }
 0x23f   : > { %1375 = vmatmul.mubr.bf16.vlgmr.msra.gmra.mrb[8].mxu0 %v822_v45  ;;  %v1238_v47 = vadd.f32 %v1231_v51, %v1050_v37  ;;  %v1233_v54 = vpop.f32.mrb[5].mxu1 }
 0x240   : > { %v1239_v55 = vadd.f32 %v1233_v54, %v1052_v38  ;;  %v1235_v56 = vpop.f32.mrb[6].mxu1 }
 0x241   : > { %v1240_v57 = vadd.f32 %v1238_v47, %v1098_v50  ;;  %v1236_v58 = vpop.f32.mrb[7].mxu1 }
 0x242   : > { %v1241_v59 = vadd.f32 %v1239_v55, %v1099_v53 }
 0x243   : > { %1242 = vst [vmem:[#allocation2] sm:$0xff] %v1240_v57 }
 0x244   : > { %1243 = vst [vmem:[#allocation2 + $0x8] sm:$0xff] %v1241_v59 }
 0x24a   : > { %v1397_v8 = vld [vmem:[#allocation2] sm:$0xff] (!%p1769_p7) }
 0x24b   : > { %v1399_v9 = vadd.f32 (!%p1769_p7), %v1397_v8, %v1393_v7  ;;  %v1398_v11 = vld [vmem:[#allocation2 + $0x8] sm:$0xff] (!%p1769_p7) }
 0x24c   : > { %v1400_v14 = vadd.f32 (!%p1769_p7), %v1398_v11, %v1394_v10 }
 0x24d   : > { %v1770_v12 = vmul.f32 (!%p1769_p7), -1.442695, %v1399_v9 }
 0x24e   : > { %v1771_v15 = vmul.f32 (!%p1769_p7), -1.442695, %v1400_v14 }
 0x24f   : > { %2036 = vpow2.f32 (!%p1769_p7), %v1770_v12 }
 0x250   : > { %2038 = vpow2.f32 (!%p1769_p7), %v1771_v15 }
 0x259   : > { %v2037_v21 = vpop.eup (!%p1769_p7), %2036 }
 0x25a   : > { %v1407_v22 = vadd.f32 (!%p1769_p7), 1.0, %v2037_v21  ;;  %v2039_v23 = vpop.eup (!%p1769_p7), %2038 }
 0x25b   : > { %v1408_v24 = vadd.f32 (!%p1769_p7), 1.0, %v2039_v23 }
 0x312   : > { %v1376_v61 = vpop.f32.mrb[8].mxu0  ;;  %1392 = sbr.rel (%p1769_p7) target bundleno = 822 (0x336), region = 96 }
 0x313   : > { %v1383_v62 = vadd.f32 %v1376_v61, %v1091_v46  ;;  %v1378_v0 = vpop.f32.mrb[9].mxu0 }
 0x314   : > { %v1384_v1 = vadd.f32 %v1378_v0, %v1093_v48  ;;  %v1380_v2 = vpop.f32.mrb[10].mxu0 }
 0x315   : > { %v1385_v4 = vadd.f32 %v1383_v62, %v1244_v60  ;;  %v1381_v5 = vpop.f32.mrb[11].mxu0 }
 0x316   : > { %v1386_v6 = vadd.f32 %v1384_v1, %v1245_v63 }
 0x317   : > { %1387 = vst [vmem:[#allocation3] sm:$0xff] %v1385_v4 }
 0x318   : > { %1388 = vst [vmem:[#allocation3 + $0x8] sm:$0xff] %v1386_v6 }
 0x31e   : > { %v1413_v17 = vld [vmem:[#allocation3] sm:$0xff] }
 0x31f   : > { %v1414_v3 = vld [vmem:[#allocation3 + $0x8] sm:$0xff]  ;;  %v1415_v19 = vadd.f32 %v1413_v17, %v1395_v16 }
 0x320   : > { %v1416_v20 = vadd.f32 %v1414_v3, %v1396_v18 }
 0x321   : > { %2040 = vtanh.f32 %v1415_v19 }
 0x322   : > { %2042 = vtanh.f32 %v1416_v20 }
 0x323   : > { %2044 = vrcp.f32 %v1407_v22 }
 0x324   : > { %2046 = vrcp.f32 %v1408_v24 }
 0x32b   : > { %v2041_v25 = vpop.eup %2040 }
 0x32c   : > { %v2043_v26 = vpop.eup %2042 }
 0x32d   : > { %v2045_v28 = vpop.eup %2044 }
 0x32e   : > { %v1419_v29 = vmul.f32 %v2045_v28, %v2041_v25  ;;  %v1421_v30 = vsub.f32 1.0, %v2045_v28  ;;  %v2047_v31 = vpop.eup %2046 }
 0x32f   : > { %v1420_v33 = vmul.f32 %v2047_v31, %v2043_v26  ;;  %v1422_v34 = vsub.f32 1.0, %v2047_v31 }
 0x330   : > { %v1423_v32 = vmul.f32 %v1421_v30, %v2862_v27 }
 0x331   : > { %v1424_v36 = vmul.f32 %v1422_v34, %v2846_v13 }
 0x332   : > { %v1425_v35 = vadd.f32 %v1423_v32, %v1419_v29 }
 0x333   : > { %v1426_v37 = vadd.f32 %v1424_v36, %v1420_v33 }
 0x334   : > { %1427 = vst [vmem:[#allocation18] sm:$0xff] %v1425_v35 }
 0x335   : > { %1428 = vst [vmem:[#allocation18 + $0x8] sm:$0xff] %v1426_v37 }
 0x336 PF: > { %s3046_s24 = sld [smem:[#allocation29_spill]]  ;;  %s2402_s17 = smov [#allocation18]  }
 0x337   : > { %s1439_s19 = sshll.u32 %s2402_s17, 4  ;;  %s1440_s19 = int_to_ptr.vmem [resolvable:$true] %s1439_s19 }
 0x338   : > { %s2284_s25 = scalar_lea.vmem %s1440_s19, 256  ;;  %p2291_p11 = scmp.lt.s32.totalorder %s1440_s19, %s1440_s19 }
 0x339   : > { %p2285_p3 = scmp.ne.s32.totalorder %s1440_s19, %s2284_s25  ;;  %p2292_p10 = scmp.lt.s32.totalorder %s2284_s25, %s2284_s25 }
 0x33b   : > { %p2293_p9 = por %p2292_p10, %p2291_p11 }
 0x33c   : > { %p1859_p1 = scmp.eq.s32.totalorder %s3046_s24, 1 }
 0x33e   : > { %p2286_p8 = pnand %p2285_p3, %p1859_p1 }
 0x340   : > { %p2287_p5 = pneg %p2286_p8 }
 0x342   : > { %p2294_p12 = pnand %p2293_p9, %p2287_p5 }
 0x344   : > { %2297 = shalt.err (!%p2294_p12)
}
 0x345   : > { %s3047_s23 = sld [smem:[#allocation36_spill]] }
 0x34b   : > { %s2298_s15 = scalar_lea.hbm %s3047_s23, 256 }
 0x34c   : > { %p2299_p0 = scmp.ne.s32.totalorder %s3047_s23, %s2298_s15  ;;  %p2304_p4 = scmp.lt.u32.totalorder %s2298_s15, %s3047_s23 }
 0x34e   : > { %p2300_p6 = pnand %p2299_p0, %p1859_p1 }
 0x350   : > { %p2301_p13 = pneg %p2300_p6 }
 0x352   : > { %p2306_p2 = pnand %p2304_p4, %p2301_p13 }
 0x354   : > { %2309 = shalt.err (!%p2306_p2)
}
 0x355   : > { %1825 = dma.vmem_to_hbm [thread:$0]  (%p1859_p1), %s1440_s19, 256, %s3047_s23, [#allocation6]  }
 0x356   : > { %2359 = dma.done.wait (%p1859_p1), [#allocation6], 256  }
 0x357   : > { %2361 = vsyncadd (%p1859_p1), [#allocation6], 4294967040 }
 0x358 PF: > { %s3048_s30 = sld [smem:[#allocation28_spill]]  ;;  %s3049_s9 = sld [smem:[#allocation26_spill]] }
 0x359   : > { %s3050_s11 = sld [smem:[#allocation31_spill]]  ;;  %s3051_s26 = sld [smem:[#allocation30_spill]] }
 0x35a   : > { %s3054_s12 = smov %s2380_s13 }
 0x35e   : > { %s33_s14 = sadd.s32 1, %s3048_s30   ;;  %s3052_s30 = smov %s2368_s10 }
 0x35f   : > { %p30_p7 = scmp.ge.s32.totalorder %s33_s14, 4   ;;  %s3053_s10 = smov %s3049_s9 }
 0x360   : > { %s3055_s13 = smov %s3051_s26 }
 0x361   :  { %32 = sbr.rel (!%p30_p7) target bundleno = 18 (0x12), region = 176 }
 0x368   :  { %1452 = vsyncpa [#allocation5], 1 }
 0x369   :  { %1454 = vsyncpa [#allocation5 + $0x1], 1 }
 0x36a   :  { %1455 = vsyncpa [#allocation8], 1 }
 0x36b   :  { %1457 = vsyncpa [#allocation8 + $0x1], 1 }
 0x36c   :  { %1458 = vsyncpa [#allocation11], 1 }
 0x36d   :  { %1460 = vsyncpa [#allocation11 + $0x1], 1 }
 0x36e   :  { %1461 = vsyncpa [#allocation14], 1 }
 0x36f   :  { %1463 = vsyncpa [#allocation14 + $0x1], 1 }
 0x370   :  { %1464 = vsyncpa [#allocation17], 1 }
 0x371   :  { %1465 = vsyncpa [#allocation6], 1 }
 0x372   :  { %1467 = vsyncpa [#allocation6 + $0x1], 1 }

</bundles_post_ra>
